<compile_context>
chip_gen: v5e
topology: v5e:2x2
jax: 0.10.0
libtpu: 0.0.40
codegen_flags: <defaults>
</compile_context>

<pallas_src>
import functools

import jax
import jax.numpy as jnp
from jax.experimental import pallas as pl
from jax.experimental.pallas import tpu as pltpu

LANE = 128


def _round_up(x, m):
    return (x + m - 1) // m * m


def _vmem_caps():
    """(tile-planning budget, scoped-vmem request) derived per TPU generation."""
    try:
        cap = int(pltpu.get_tpu_info().vmem_capacity_bytes)
    except Exception:
        cap = 64 * 1024 * 1024          # conservative fallback: v7x physical VMEM per TC
    return int(cap * 0.70), int(cap * 0.80)


def _pick_thw(hw_pad, c, n_batch, budget):
    """Largest spatial tile (multiple of 128 dividing hw_pad) whose VMEM footprint fits.

    Footprint counts double buffers for the x tile, the out tile AND the resident
    (constant-index-map) weight + bias.  Among fitting tiles, prefer ones that keep at
    least 4 total grid steps so both v7x TensorCores get work (v5e/v6e unaffected)."""
    const_foot = 2 * (c * c + c) * 4            # weight + bias, double-buffered
    fit, fit_balanced = LANE, None
    t = LANE
    while t <= hw_pad:
        if hw_pad % t == 0:
            foot = const_foot + 2 * 2 * c * t * 4   # 2 arrays (x, out) x 2 buffers each
            if foot <= budget:
                fit = t
                if n_batch * (hw_pad // t) >= 4:
                    fit_balanced = t
        t += LANE
    return fit_balanced if fit_balanced is not None else fit


# ----------------------------------------------------------------------------
# Fused kernel: 1x1 conv (W @ x) + bias + sigmoid + elementwise gate
# ----------------------------------------------------------------------------
def _sam_kernel(x_ref, w_ref, b_ref, o_ref):
    x = x_ref[0]                                                     # (C, tHW) f32
    y = jnp.dot(w_ref[...], x, preferred_element_type=jnp.float32) + b_ref[...]
    o_ref[0] = x * jax.nn.sigmoid(y)                                 # logistic -> EUP


def sam_forward(x_nchw, params):
    """x: (N, C, H, W) float32.
    params: {'w': (C_out, C_in) == torch_weight[:, :, 0, 0], 'b': (C,)}.
    Returns (N, C, H, W) float32 == x * sigmoid(conv1x1(x))."""
    n, c, h, w = x_nchw.shape
    hw = h * w
    x3 = x_nchw.reshape(n, c, hw).astype(jnp.float32)        # free reshape, stays NCHW

    hw_pad = _round_up(hw, LANE)
    if hw_pad != hw:
        # Rare case (H*W not a multiple of 128): pad the lane axis with zeros; padded
        # outputs are 0 * sigmoid(b) = 0 and are sliced off below.
        x3 = jnp.pad(x3, ((0, 0), (0, 0), (0, hw_pad - hw)))

    budget, vmem_limit = _vmem_caps()
    thw = _pick_thw(hw_pad, c, n, budget)

    # TODO(synk): for very large C (>= ~3k) the resident (C, C) weight alone exceeds the
    # VMEM budget and would need an output-channel grid axis; not needed for CBAM/SAM.
    # (Likewise, bf16 matmul operands would help only on v5e at C >= ~256.)
    w_mat = params["w"].astype(jnp.float32)                  # (C_out, C_in)
    b_col = params["b"].astype(jnp.float32).reshape(c, 1)    # broadcasts over spatial

    cost = pl.CostEstimate(
        flops=2 * n * hw_pad * c * c,
        transcendentals=n * hw_pad * c,
        bytes_accessed=2 * n * c * hw_pad * 4 + c * c * 4 + c * 4,
    )

    out = pl.pallas_call(
        _sam_kernel,
        out_shape=jax.ShapeDtypeStruct((n, c, hw_pad), jnp.float32),
        grid_spec=pltpu.PrefetchScalarGridSpec(
            num_scalar_prefetch=0,
            grid=(n, hw_pad // thw),
            in_specs=[
                pl.BlockSpec((1, c, thw), lambda i, j: (i, 0, j)),   # x spatial tile
                pl.BlockSpec((c, c), lambda i, j: (0, 0)),           # full weight, resident
                pl.BlockSpec((c, 1), lambda i, j: (0, 0)),           # bias column, resident
            ],
            out_specs=pl.BlockSpec((1, c, thw), lambda i, j: (i, 0, j)),
        ),
        compiler_params=pltpu.CompilerParams(
            dimension_semantics=("parallel", "parallel"),
            vmem_limit_bytes=vmem_limit),
        cost_estimate=cost,
    )(x3, w_mat, b_col)

    if hw_pad != hw:
        out = out[:, :, :hw]
    return out.reshape(n, c, h, w)


# ----------------------------------------------------------------------------
# Pure-JAX reference (for correctness check only)
# ----------------------------------------------------------------------------
def sam_reference(x_nchw, params):
    n, c, h, w = x_nchw.shape
    x3 = x_nchw.reshape(n, c, h * w)
    y = jnp.einsum("oc,ncp->nop", params["w"], x3) + params["b"][None, :, None]
    return (x3 * jax.nn.sigmoid(y)).reshape(n, c, h, w)


if __name__ == "__main__":
    key = jax.random.PRNGKey(0)
    k_x, k_w, k_b = jax.random.split(key, 3)

    # Small shapes consistent with the module: batch=2, in_ch=64, 16x16 spatial.
    N, C, H, W = 2, 64, 16, 16
    x = jax.random.normal(k_x, (N, C, H, W), jnp.float32)
    params = {
        "w": jax.random.normal(k_w, (C, C), jnp.float32) / jnp.sqrt(float(C)),
        "b": 0.1 * jax.random.normal(k_b, (C,), jnp.float32),
    }

    fwd = jax.jit(functools.partial(sam_forward, params=params))
    out = fwd(x)
    jax.block_until_ready(out)

    assert out.shape == (N, C, H, W), out.shape
    ref = sam_reference(x, params)
    max_err = float(jnp.max(jnp.abs(out - ref)))
    assert jnp.allclose(out, ref, atol=1e-4, rtol=1e-4), max_err
    assert bool(jnp.all(jnp.isfinite(out)))

    print("KERNEL_OK")
</pallas_src>

<mosaic_0001>
module attributes {stable_mosaic.version = 11 : i64} {
  func.func @_sam_kernel(%arg0: i32, %arg1: i32, %arg2: memref<1x64x128xf32, #tpu.memory_space<vmem>>, %arg3: memref<64x64xf32, #tpu.memory_space<vmem>>, %arg4: memref<64x1xf32, #tpu.memory_space<vmem>>, %arg5: memref<1x64x128xf32, #tpu.memory_space<vmem>>) attributes {dimension_semantics = [#tpu.dimension_semantics<parallel>, #tpu.dimension_semantics<parallel>], iteration_bounds = array<i64: 2, 2>, scalar_prefetch = 0 : i64, scratch_operands = 0 : i64, tpu.core_type = #tpu.core_type<tc>, window_params = [{transform_indices = @transform_0, window_bounds = array<i64: 1, 64, 128>}, {pipeline_mode = #tpu.pipeline_mode<synchronous>, transform_indices = @transform_1, window_bounds = array<i64: 64, 64>}, {pipeline_mode = #tpu.pipeline_mode<synchronous>, transform_indices = @transform_2, window_bounds = array<i64: 64, 1>}, {transform_indices = @transform_3, window_bounds = array<i64: 1, 64, 128>}]} {
    %c0 = arith.constant 0 : index
    %c0_0 = arith.constant 0 : index
    %c0_1 = arith.constant 0 : index
    %0 = vector.load %arg2[%c0, %c0_0, %c0_1] : memref<1x64x128xf32, #tpu.memory_space<vmem>>, vector<1x64x128xf32>
    %1 = vector.shape_cast %0 : vector<1x64x128xf32> to vector<64x128xf32>
    %c0_2 = arith.constant 0 : index
    %c0_3 = arith.constant 0 : index
    %2 = vector.load %arg3[%c0_2, %c0_3] : memref<64x64xf32, #tpu.memory_space<vmem>>, vector<64x64xf32>
    %cst = arith.constant dense<0.000000e+00> : vector<64x128xf32>
    %3 = tpu.matmul %2, %1, %cst {dimension_numbers = #tpu.dot_dimension_numbers<[1], [0], [0], [1], [0, 0, 1, 1], [], []>} : vector<64x64xf32>, vector<64x128xf32>, vector<64x128xf32> -> vector<64x128xf32>
    %c0_4 = arith.constant 0 : index
    %c0_5 = arith.constant 0 : index
    %4 = vector.load %arg4[%c0_4, %c0_5] : memref<64x1xf32, #tpu.memory_space<vmem>>, vector<64x1xf32>
    %5 = vector.broadcast %4 : vector<64x1xf32> to vector<64x128xf32>
    %6 = arith.addf %3, %5 : vector<64x128xf32>
    %7 = arith.negf %6 : vector<64x128xf32>
    %8 = math.exp %7 : vector<64x128xf32>
    %cst_6 = arith.constant 1.000000e+00 : f32
    %9 = vector.broadcast %cst_6 : f32 to vector<64x128xf32>
    %10 = arith.addf %9, %8 : vector<64x128xf32>
    %11 = arith.divf %9, %10 : vector<64x128xf32>
    %12 = arith.mulf %1, %11 : vector<64x128xf32>
    %c0_7 = arith.constant 0 : index
    %c0_8 = arith.constant 0 : index
    %c0_9 = arith.constant 0 : index
    %13 = vector.load %arg5[%c0_7, %c0_8, %c0_9] : memref<1x64x128xf32, #tpu.memory_space<vmem>>, vector<1x64x128xf32>
    %14 = vector.shape_cast %13 : vector<1x64x128xf32> to vector<64x128xf32>
    %15 = vector.shape_cast %12 : vector<64x128xf32> to vector<1x64x128xf32>
    tpu.vector_store %arg5[%c0_7, %c0_8, %c0_9], %15 {strides = array<i32>} : memref<1x64x128xf32, #tpu.memory_space<vmem>>, vector<1x64x128xf32>,
    return
  }
  func.func @transform_0(%arg0: i32, %arg1: i32) -> (i32, i32, i32) {
    %c0_i32 = arith.constant 0 : i32
    %c0_i32_0 = arith.constant 0 : i32
    return %arg0, %c0_i32, %arg1 : i32, i32, i32
  }
  func.func @transform_1(%arg0: i32, %arg1: i32) -> (i32, i32) {
    %c0_i32 = arith.constant 0 : i32
    %c0_i32_0 = arith.constant 0 : i32
    %c0_i32_1 = arith.constant 0 : i32
    return %c0_i32, %c0_i32_0 : i32, i32
  }
  func.func @transform_2(%arg0: i32, %arg1: i32) -> (i32, i32) {
    %c0_i32 = arith.constant 0 : i32
    %c0_i32_0 = arith.constant 0 : i32
    %c0_i32_1 = arith.constant 0 : i32
    return %c0_i32, %c0_i32_0 : i32, i32
  }
  func.func @transform_3(%arg0: i32, %arg1: i32) -> (i32, i32, i32) {
    %c0_i32 = arith.constant 0 : i32
    %c0_i32_0 = arith.constant 0 : i32
    return %arg0, %c0_i32, %arg1 : i32, i32, i32
  }
}

</mosaic_0001>

<bundles_post_ra>
// kernel: sam_forward.1
= control target key start
LH: loop header
LB: loop body
LE: loop exit
PB: predicated region body
PF: predicated region fallthrough
CT: control target
= control target key end

     0   :  { %s912_s12 = smov 0   ;;  %s914_s13 = smov 0   ;;  %s1228_s0 = inlined_call_operand.vmem [shape: f32[2,64,256], index: 0, kind: input, shape index: {}]   ;;  %s1229_s1 = inlined_call_operand.vmem [shape: f32[64,64], index: 1, kind: input, shape index: {}]   ;;  %s1230_s2 = inlined_call_operand.vmem [shape: f32[64,1], index: 2, kind: input, shape index: {}]   ;;  %s1231_s3 = inlined_call_operand.vmem [shape: f32[2,64,256], index: 3, kind: output, shape index: {}]  }
   0x1   :  { %s916_s14 = smov 0   ;;  %s918_s15 = smov 0  }
   0x2   :  { %s920_s16 = smov 0   ;;  %s922_s17 = smov 0  }
   0x3   :  { %s924_s18 = smov 0  }
   0x4 LB: > { %s22_s19 = sadd.s32 1, %s881_s16  ;;  %s25_s20 = sadd.s32 1, %s885_s17  ;;  %s889_s18 = sphi %s924_s18, %s13_s18   ;;  %s885_s17 = sphi %s922_s17, %s1246_s17   ;;  %s881_s16 = sphi %s920_s16, %s1245_s16   ;;  %s877_s15 = sphi %s918_s15, %s1244_s15   ;;  %s873_s14 = sphi %s916_s14, %s1243_s14   ;;  %s869_s13 = sphi %s914_s13, %s1242_s13   ;;  %s865_s12 = sphi %s912_s12, %s1241_s12  }
   0x5   : > { %p23_p0 = scmp.ge.s32.totalorder %s22_s19, 2  ;;  %s688_s21 = sadd.s32 4294967295, %s889_s18  }
   0x6   : > { %p41_p1 = scmp.ne.s32.totalorder %s869_s13, %s865_s12  ;;  %p42_p2 = scmp.eq.s32.totalorder %s889_s18, 0 }
   0x7   : > { %s1248_s19 = smov (%p23_p0, %s22_s19), 0  ;;  %s1250_s20 = smov (!%p23_p0, %s25_s20), %s885_s17 }
   0x8   : > { %p27_p3 = scmp.ge.s32.totalorder %s1250_s20, 2  ;;  %p115_p4 = scmp.eq.s32.totalorder %s688_s21, 3 }
   0x9   : > { %s30_s22 = ssub.s32 %s881_s16, %s1248_s19  ;;  %p43_p5 = por %p42_p2, %p41_p1 }
   0xa   : > { %s1252_s20 = smov (%p27_p3, %s1250_s20), 0  ;;  %p960_p6 = por %p115_p4, %p41_p1 }
   0xb   : > { %s29_s24 = ssub.s32 %s885_s17, %s1252_s20  ;;  %s34_s26 = sadd.s32 1, %s869_s13 }
   0xc   : > { %s31_s25 = sor.u32 %s30_s22, %s29_s24  ;;  %p691_p8 = scmp.ge.s32.totalorder %s889_s18, 4 }
   0xd   : > { %p32_p7 = scmp.eq.s32.totalorder %s31_s25, 0 }
   0xe   : > { %143 = sbr.rel (%p691_p8) target bundleno = 33 (0x21), region = 24 }
   0xf   : > { %s968_s27 = scalar_select %p32_p7, %s869_s13, %s34_s26  }
  0x13   : > { %146 = sbr.rel (!%p43_p5) target bundleno = 33 (0x21), region = 28  ;;  %s148_s28 = sand.u32 (%p43_p5), 1, %s869_s13  }
  0x14   : > { %s693_s29 = sshll.u32 (%p43_p5), %s885_s17, 4  ;;  %s692_s30 = sshll.u32 (%p43_p5), %s148_s28, 6 }
  0x15   : > { %s152_s4 = sadd.s32 (%p43_p5), %s881_s16, %s693_s29  ;;  %s150_s9 = scalar_lea.vmem (%p43_p5), [#allocation2], %s692_s30 }
  0x16   : > { %s694_s5 = sshll.u32 (%p43_p5), %s152_s4, 3 }
  0x17   : > { %s154_s8 = scalar_lea.vmem (%p43_p5), %s1228_s0, %s694_s5 }
  0x18   : > { %v197_v0 = vld [vmem:[%s154_s8] sm:$0xff]  ;;  %v199_v1 = vld [vmem:[%s154_s8 + $0x10] sm:$0xff] }
  0x19   : > { %v201_v2 = vld [vmem:[%s154_s8 + $0x20] sm:$0xff]  ;;  %198 = vst [vmem:[%s150_s9] sm:$0xff] %v197_v0  ;;  %v203_v3 = vld [vmem:[%s154_s8 + $0x30] sm:$0xff] }
  0x1a   : > { %200 = vst [vmem:[%s150_s9 + $0x8] sm:$0xff] %v199_v1  ;;  %v205_v4 = vld [vmem:[%s154_s8 + $0x40] sm:$0xff]  ;;  %v207_v5 = vld [vmem:[%s154_s8 + $0x50] sm:$0xff] }
  0x1b   : > { %202 = vst [vmem:[%s150_s9 + $0x10] sm:$0xff] %v201_v2  ;;  %v209_v6 = vld [vmem:[%s154_s8 + $0x60] sm:$0xff]  ;;  %v211_v7 = vld [vmem:[%s154_s8 + $0x70] sm:$0xff] }
  0x1c   : > { %204 = vst [vmem:[%s150_s9 + $0x18] sm:$0xff] %v203_v3 }
  0x1d   : > { %206 = vst [vmem:[%s150_s9 + $0x20] sm:$0xff] %v205_v4 }
  0x1e   : > { %208 = vst [vmem:[%s150_s9 + $0x28] sm:$0xff] %v207_v5 }
  0x1f   : > { %210 = vst [vmem:[%s150_s9 + $0x30] sm:$0xff] %v209_v6 }
  0x20   : > { %212 = vst [vmem:[%s150_s9 + $0x38] sm:$0xff] %v211_v7 }
  0x21 PF: > { %p695_p9 = scmp.ge.s32.totalorder %s889_s18, 1  ;;  %p217_p10 = scmp.lt.s32.totalorder %s889_s18, 5 }
  0x23   : > { %p218_p11 = pnand %p695_p9, %p217_p10 }
  0x24   : > { %s224_s10 = sand.u32 (!%p218_p11), 1, %s865_s12  }
  0x25   : > { %221 = sbr.rel (%p218_p11) target bundleno = 248 (0xf8), region = 66  ;;  %s986_s25 = sshll.u32 (!%p218_p11), %s224_s10, 6 }
  0x26   : > { %s989_s26 = scalar_lea.vmem (!%p218_p11), [#allocation2], %s986_s25  ;;  %s1134_s21 = scalar_lea.vmem (!%p218_p11), [#allocation3], %s986_s25 }
  0x2a   : > { %v264_v8 = vld [vmem:[%s1230_s2 + $0x10] sm:$0xff]  ;;  %v262_v9 = vld [vmem:[%s1230_s2] sm:$0xff]  ;;  %v891_v10 = vmov 0   ;;  %v992_v11 = vld [vmem:[%s989_s26 + $0x38] sm:$0xff]  ;;  %vm310_vm0 = vcmask 523264   ;;  %s715_s25 = sshll.u32 (%p960_p6), %s877_s15, 4 }
  0x2b   : > { %801 = vset.pattern.permute.xlu1 %v891_v10  ;;  %800 = vset.pattern.permute.xlu0 %v891_v10  ;;  %v995_v12 = vld [vmem:[%s989_s26 + $0x30] sm:$0xff]  ;;  %v1002_v13 = vld [vmem:[%s989_s26 + $0x28] sm:$0xff]  ;;  %v1009_v14 = vld [vmem:[%s989_s26 + $0x20] sm:$0xff]  ;;  %s552_s22 = sadd.s32 (%p960_p6), %s873_s14, %s715_s25 }
  0x2c   : > { %282 = vperm.xlu1 %801, %v264_v8   ;;  %272 = vperm.xlu0 %800, %v262_v9   ;;  %v1016_v15 = vld [vmem:[%s989_s26 + $0x18] sm:$0xff]  ;;  %v1023_v16 = vld [vmem:[%s989_s26 + $0x10] sm:$0xff]  ;;  %v1030_v17 = vld [vmem:[%s989_s26 + $0x8] sm:$0xff]  ;;  %s716_s24 = sshll.u32 (%p960_p6), %s552_s22, 3 }
  0x2d   : > { %802 = vset.pattern.permute.xlu2 %v891_v10  ;;  %343 = vmatpush.msra.mxu0 %v992_v11  ;;  %v1037_v18 = vld [vmem:[%s989_s26] sm:$0xff]  ;;  %v256_v20 = vld [vmem:[%s1229_s1 + $0x10] sm:$0xff]  ;;  %v265_v23 = vld [vmem:[%s1230_s2 + $0x18] sm:$0xff]  ;;  %s554_s23 = scalar_lea.vmem (%p960_p6), %s1231_s3, %s716_s24 }
  0x2e   : > { %719 = vmatpush.msra.mxu1 %v992_v11  ;;  %720 = vmatpush.msra.mxu2 %v992_v11  ;;  %v254_v19 = vld [vmem:[%s1229_s1] sm:$0xff]  ;;  %v260_v22 = vld [vmem:[%s1229_s1 + $0x30] sm:$0xff]  ;;  %v263_v24 = vld [vmem:[%s1230_s2 + $0x8] sm:$0xff] }
  0x2f   : > { %721 = vmatpush.msra.mxu3 %v992_v11  ;;  %344 = vmatpush.msra.mxu0 %v995_v12  ;;  %v258_v21 = vld [vmem:[%s1229_s1 + $0x20] sm:$0xff]  ;;  %v255_v26 = vld [vmem:[%s1229_s1 + $0x8] sm:$0xff]  ;;  %v257_v27 = vld [vmem:[%s1229_s1 + $0x18] sm:$0xff] }
  0x30   : > { %722 = vmatpush.msra.mxu1 %v995_v12  ;;  %723 = vmatpush.msra.mxu2 %v995_v12  ;;  %v266_v25 = vld [vmem:[%s1230_s2 + $0x20] sm:$0xff]  ;;  %v259_v28 = vld [vmem:[%s1229_s1 + $0x28] sm:$0xff]  ;;  %v261_v29 = vld [vmem:[%s1229_s1 + $0x38] sm:$0xff] }
  0x31   : > { %724 = vmatpush.msra.mxu3 %v995_v12  ;;  %345 = vmatpush.msra.mxu0 %v1002_v13  ;;  %v269_v30 = vld [vmem:[%s1230_s2 + $0x38] sm:$0xff]  ;;  %v268_v31 = vld [vmem:[%s1230_s2 + $0x30] sm:$0xff]  ;;  %v267_v32 = vld [vmem:[%s1230_s2 + $0x28] sm:$0xff] }
  0x32   : > { %725 = vmatpush.msra.mxu1 %v1002_v13  ;;  %726 = vmatpush.msra.mxu2 %v1002_v13 }
  0x33   : > { %727 = vmatpush.msra.mxu3 %v1002_v13  ;;  %346 = vmatpush.msra.mxu0 %v1009_v14 }
  0x34   : > { %728 = vmatpush.msra.mxu1 %v1009_v14  ;;  %729 = vmatpush.msra.mxu2 %v1009_v14 }
  0x35   : > { %730 = vmatpush.msra.mxu3 %v1009_v14  ;;  %347 = vmatpush.msra.mxu0 %v1016_v15 }
  0x36   : > { %731 = vmatpush.msra.mxu1 %v1016_v15  ;;  %732 = vmatpush.msra.mxu2 %v1016_v15 }
  0x37   : > { %733 = vmatpush.msra.mxu3 %v1016_v15  ;;  %348 = vmatpush.msra.mxu0 %v1023_v16 }
  0x38   : > { %734 = vmatpush.msra.mxu1 %v1023_v16  ;;  %735 = vmatpush.msra.mxu2 %v1023_v16 }
  0x39   : > { %736 = vmatpush.msra.mxu3 %v1023_v16  ;;  %349 = vmatpush.msra.mxu0 %v1030_v17 }
  0x3a   : > { %737 = vmatpush.msra.mxu1 %v1030_v17  ;;  %738 = vmatpush.msra.mxu2 %v1030_v17 }
  0x3b   : > { %739 = vmatpush.msra.mxu3 %v1030_v17  ;;  %350 = vmatpush.msra.mxu0 %v1037_v18 }
  0x3c   : > { %740 = vmatpush.msra.mxu1 %v1037_v18  ;;  %741 = vmatpush.msra.mxu2 %v1037_v18 }
  0x3d   : > { %742 = vmatpush.msra.mxu3 %v1037_v18  ;;  %698 = vmatmul.msk.f32.vlgmr.msra.gmra.mxu0 %vm310_vm0, %v254_v19 }
  0x3e   : > { %700 = vmatmul.msk.f32.vlgmr.msra.gmra.mxu1 %vm310_vm0, %v256_v20  ;;  %702 = vmatmul.msk.f32.vlgmr.msra.gmra.mxu2 %vm310_vm0, %v258_v21 }
  0x3f   : > { %704 = vmatmul.msk.f32.vlgmr.msra.gmra.mxu3 %vm310_vm0, %v260_v22  ;;  %287 = vperm.xlu1 %801, %v265_v23  }
  0x40   : > { %277 = vperm.xlu0 %800, %v263_v24   ;;  %292 = vperm.xlu2 %802, %v266_v25  }
  0x45   : > { %699 = vmatmul.msk.f32.gmra.mxu0 %vm310_vm0, %v255_v26 }
  0x46   : > { %701 = vmatmul.msk.f32.gmra.mxu1 %vm310_vm0, %v257_v27  ;;  %703 = vmatmul.msk.f32.gmra.mxu2 %vm310_vm0, %v259_v28 }
  0x47   : > { %705 = vmatmul.msk.f32.gmra.mxu3 %vm310_vm0, %v261_v29  ;;  %307 = vperm.xlu1 %801, %v269_v30  }
  0x48   : > { %302 = vperm.xlu0 %800, %v268_v31   ;;  %297 = vperm.xlu2 %802, %v267_v32  }
  0x9a   : > { %v293_v42 = vpop.permute.xlu2 %292 }
  0x9e   : > { %v273_v33 = vpop.permute.xlu0 %272  ;;  %v283_v34 = vpop.permute.xlu1 %282 }
  0xa2   : > { %v298_v61 = vpop.permute.xlu2 %297 }
  0xb1   : > { %v288_v43 = vpop.permute.xlu1 %287 }
  0xb2   : > { %v278_v35 = vpop.permute.xlu0 %277 }
  0xb9   : > { %v308_v1 = vpop.permute.xlu1 %307 }
  0xba   : > { %v352_v36 = vpop.f32.mrf.mxu0  ;;  %v303_v44 = vpop.permute.xlu0 %302 }
  0xbb   : > { %v358_v37 = vpop.f32.mrf.mxu1  ;;  %v353_v38 = vadd.f32 %v352_v36, %v273_v33 }
  0xbc   : > { %v359_v39 = vadd.f32 %v358_v37, %v283_v34 }
  0xbd   : > { %v706_v40 = vmul.f32 -1.442695, %v353_v38 }
  0xbe   : > { %v708_v41 = vmul.f32 -1.442695, %v359_v39 }
  0xbf   : > { %803 = vpow2.f32 %v706_v40 }
  0xc0   : > { %805 = vpow2.f32 %v708_v41 }
  0xc1   : > { %v364_v45 = vpop.f32.mrf.mxu2 }
  0xc2   : > { %v370_v46 = vpop.f32.mrf.mxu3  ;;  %v365_v47 = vadd.f32 %v364_v45, %v293_v42  ;;  %v355_v49 = vpop.f32.mrf.mxu0 }
  0xc3   : > { %v371_v48 = vadd.f32 %v370_v46, %v303_v44  ;;  %v361_v50 = vpop.f32.mrf.mxu1  ;;  %v356_v51 = vadd.f32 %v355_v49, %v278_v35 }
  0xc4   : > { %v362_v52 = vadd.f32 %v361_v50, %v288_v43  ;;  %v710_v53 = vmul.f32 -1.442695, %v365_v47 }
  0xc5   : > { %v712_v54 = vmul.f32 -1.442695, %v371_v48  ;;  %v804_v55 = vpop.eup %803  ;;  %v707_v58 = vmul.f32 -1.442695, %v356_v51 }
  0xc6   : > { %v806_v56 = vpop.eup %805  ;;  %v400_v57 = vadd.f32 1.0, %v804_v55  ;;  %807 = vpow2.f32 %v710_v53  ;;  %v709_v60 = vmul.f32 -1.442695, %v362_v52 }
  0xc7   : > { %v402_v59 = vadd.f32 1.0, %v806_v56  ;;  %809 = vpow2.f32 %v712_v54 }
  0xc8   : > { %811 = vrcp.f32 %v400_v57  ;;  %v417_v7 = vand.u32 2147483647, %v400_v57  ;;  %vm413_vm1 = vweird.f32 %v400_v57  ;;  %v419_v21 = vand.u32 2147483648, %v400_v57 }
  0xc9   : > { %813 = vrcp.f32 %v402_v59  ;;  %v367_v62 = vpop.f32.mrf.mxu2  ;;  %v447_v26 = vand.u32 2147483647, %v402_v59  ;;  %v449_v27 = vand.u32 2147483648, %v402_v59  ;;  %vm443_vm3 = vweird.f32 %v402_v59 }
  0xca   : > { %v373_v63 = vpop.f32.mrf.mxu3  ;;  %815 = vpow2.f32 %v707_v58  ;;  %v368_v0 = vadd.f32 %v367_v62, %v298_v61  ;;  %vm1103_vm2 = vcmp.eq.f32.partialorder %v417_v7, 8.507059e+37  ;;  %v420_v33 = vor.u32 1.1754944e-38, %v419_v21 }
  0xcb   : > { %817 = vpow2.f32 %v709_v60  ;;  %v374_v3 = vadd.f32 %v373_v63, %v308_v1  ;;  %vm1111_vm6 = vcmp.eq.f32.partialorder %v447_v26, 8.507059e+37  ;;  %v450_v38 = vor.u32 1.1754944e-38, %v449_v27 }
  0xcc   : > { %v808_v2 = vpop.eup %807  ;;  %v711_v9 = vmul.f32 -1.442695, %v368_v0 }
  0xcd   : > { %v810_v4 = vpop.eup %809  ;;  %v1097_v5 = vadd.f32 1.0, %v808_v2  ;;  %v713_v23 = vmul.f32 -1.442695, %v374_v3 }
  0xce   : > { %v812_v6 = vpop.eup %811  ;;  %v1099_v8 = vadd.f32 1.0, %v810_v4 }
  0xcf   : > { %v814_v10 = vpop.eup %813  ;;  %v409_v19 = vmul.f32 %v812_v6, %v400_v57  ;;  %819 = vrcp.f32 %v1097_v5  ;;  %vm414_vm4 = vweird.f32 %v812_v6  ;;  %vm473_vm8 = vweird.f32 %v1097_v5 }
  0xd0   : > { %v816_v20 = vpop.eup %815  ;;  %v439_v22 = vmul.f32 %v814_v10, %v402_v59  ;;  %821 = vrcp.f32 %v1099_v8  ;;  %vm444_vm5 = vweird.f32 %v814_v10  ;;  %vm415_vm7 = vmor %vm413_vm1, %vm414_vm4  ;;  %v477_v41 = vand.u32 2147483647, %v1097_v5 }
  0xd1   : > { %v818_v24 = vpop.eup %817  ;;  %v410_v25 = vsub.f32 1.0, %v409_v19  ;;  %823 = vpow2.f32 %v711_v9  ;;  %v1107_v31 = vadd.f32 1.0, %v816_v20  ;;  %vm445_vm9 = vmor %vm443_vm3, %vm444_vm5  ;;  %v479_v44 = vand.u32 2147483648, %v1097_v5 }
  0xd2   : > { %v440_v29 = vsub.f32 1.0, %v439_v22  ;;  %v1109_v32 = vadd.f32 1.0, %v818_v24  ;;  %825 = vpow2.f32 %v713_v23  ;;  %v507_v45 = vand.u32 2147483647, %v1099_v8 }
  0xd3   : > { %v411_v30 = vmul.f32 %v812_v6, %v410_v25  ;;  %827 = vrcp.f32 %v1107_v31  ;;  %vm503_vm10 = vweird.f32 %v1099_v8  ;;  %v509_v53 = vand.u32 2147483648, %v1099_v8 }
  0xd4   : > { %v441_v34 = vmul.f32 %v814_v10, %v440_v29  ;;  %829 = vrcp.f32 %v1109_v32  ;;  %vm1137_vm12 = vcmp.eq.f32.partialorder %v477_v41, 8.507059e+37  ;;  %v480_v59 = vor.u32 1.1754944e-38, %v479_v44 }
  0xd5   : > { %v820_v35 = vpop.eup %819  ;;  %v412_v36 = vadd.f32 %v812_v6, %v411_v30  ;;  %vm1141_vm13 = vcmp.eq.f32.partialorder %v507_v45, 8.507059e+37  ;;  %v510_v1 = vor.u32 1.1754944e-38, %v509_v53  ;;  %vm428_vm0 = vweird.f32 %v1107_v31 }
  0xd6   : > { %v442_v39 = vadd.f32 %v814_v10, %v441_v34  ;;  %v469_v40 = vmul.f32 %v820_v35, %v1097_v5  ;;  %v822_v42 = vpop.eup %821  ;;  %vm474_vm11 = vweird.f32 %v820_v35  ;;  %v432_v5 = vand.u32 2147483647, %v1107_v31 }
  0xd7   : > { %v416_v43 = vsel %vm415_vm7, %v812_v6, %v412_v36  ;;  %v824_v46 = vpop.eup %823  ;;  %v499_v50 = vmul.f32 %v822_v42, %v1099_v8  ;;  %vm504_vm14 = vweird.f32 %v822_v42  ;;  %vm475_vm15 = vmor %vm473_vm8, %vm474_vm11  ;;  %v462_v24 = vand.u32 2147483647, %v1109_v32 }
  0xd8   : > { %v421_v47 = vsel %vm1103_vm2, %v420_v33, %v416_v43  ;;  %v446_v48 = vsel %vm445_vm9, %v814_v10, %v442_v39  ;;  %v470_v49 = vsub.f32 1.0, %v469_v40  ;;  %v826_v54 = vpop.eup %825  ;;  %v1145_v61 = vadd.f32 1.0, %v824_v46  ;;  %vm505_vm1 = vmor %vm503_vm10, %vm504_vm14 }
  0xd9   : > { %v528_v51 = vmul.f32 %v421_v47, %v1037_v18  ;;  %v451_v52 = vsel %vm1111_vm6, %v450_v38, %v446_v48  ;;  %v500_v57 = vsub.f32 1.0, %v499_v50  ;;  %v828_v58 = vpop.eup %827  ;;  %v1154_v2 = vadd.f32 1.0, %v826_v54 }
  0xda   : > { %v530_v55 = vmul.f32 %v451_v52, %v1023_v16  ;;  %v471_v56 = vmul.f32 %v820_v35, %v470_v49  ;;  %v424_v63 = vmul.f32 %v828_v58, %v1107_v31  ;;  %v830_v0 = vpop.eup %829  ;;  %831 = vrcp.f32 %v1145_v61 }
  0xdb   : > { %536 = vst [vmem:[%s1134_s21] sm:$0xff] %v528_v51  ;;  %v501_v62 = vmul.f32 %v822_v42, %v500_v57  ;;  %v454_v7 = vmul.f32 %v830_v0, %v1109_v32  ;;  %vm429_vm2 = vweird.f32 %v828_v58  ;;  %v434_v10 = vand.u32 2147483648, %v1107_v31 }
  0xdc   : > { %538 = vst [vmem:[%s1134_s21 + $0x10] sm:$0xff] %v530_v55  ;;  %v472_v16 = vadd.f32 %v820_v35, %v471_v56  ;;  %v425_v6 = vsub.f32 1.0, %v424_v63  ;;  %v464_v25 = vand.u32 2147483648, %v1109_v32  ;;  %833 = vrcp.f32 %v1154_v2  ;;  %vm430_vm4 = vmor %vm428_vm0, %vm429_vm2 }
  0xdd   : > { %v502_v4 = vadd.f32 %v822_v42, %v501_v62  ;;  %v455_v22 = vsub.f32 1.0, %v454_v7  ;;  %vm459_vm3 = vweird.f32 %v830_v0  ;;  %vm433_vm5 = vcmp.eq.f32.partialorder %v432_v5, 8.507059e+37 }
  0xde   : > { %v476_v3 = vsel %vm475_vm15, %v820_v35, %v472_v16  ;;  %v426_v21 = vmul.f32 %v828_v58, %v425_v6  ;;  %v435_v28 = vor.u32 1.1754944e-38, %v434_v10  ;;  %vm458_vm6 = vweird.f32 %v1109_v32 }
  0xdf   : > { %v481_v9 = vsel %vm1137_vm12, %v480_v59, %v476_v3  ;;  %v506_v20 = vsel %vm505_vm1, %v822_v42, %v502_v4  ;;  %v456_v27 = vmul.f32 %v830_v0, %v455_v22  ;;  %vm460_vm7 = vmor %vm458_vm6, %vm459_vm3  ;;  %vm463_vm8 = vcmp.eq.f32.partialorder %v462_v24, 8.507059e+37 }
  0xe0   : > { %v532_v19 = vmul.f32 %v481_v9, %v1009_v14  ;;  %v511_v23 = vsel %vm1141_vm13, %v510_v1, %v506_v20  ;;  %v427_v26 = vadd.f32 %v828_v58, %v426_v21  ;;  %v832_v14 = vpop.eup %831  ;;  %v492_v39 = vand.u32 2147483647, %v1145_v61 }
  0xe1   : > { %v534_v8 = vmul.f32 %v511_v23, %v995_v12  ;;  %v457_v30 = vadd.f32 %v830_v0, %v456_v27  ;;  %v484_v33 = vmul.f32 %v832_v14, %v1145_v61  ;;  %v465_v12 = vor.u32 1.1754944e-38, %v464_v25 }
  0xe2   : > { %540 = vst [vmem:[%s1134_s21 + $0x20] sm:$0xff] %v532_v19  ;;  %v431_v29 = vsel %vm430_vm4, %v828_v58, %v427_v26  ;;  %v834_v37 = vpop.eup %833  ;;  %v494_v40 = vand.u32 2147483648, %v1145_v61  ;;  %vm489_vm9 = vweird.f32 %v832_v14  ;;  %vm488_vm10 = vweird.f32 %v1145_v61 }
  0xe3   : > { %542 = vst [vmem:[%s1134_s21 + $0x30] sm:$0xff] %v534_v8  ;;  %v436_v34 = vsel %vm433_vm5, %v435_v28, %v431_v29  ;;  %v461_v36 = vsel %vm460_vm7, %v830_v0, %v457_v30  ;;  %v485_v31 = vsub.f32 1.0, %v484_v33  ;;  %v514_v42 = vmul.f32 %v834_v37, %v1154_v2  ;;  %vm490_vm11 = vmor %vm488_vm10, %vm489_vm9 }
  0xe4   : > { %v529_v35 = vmul.f32 %v436_v34, %v1030_v17  ;;  %v466_v38 = vsel %vm463_vm8, %v465_v12, %v461_v36  ;;  %vm493_vm12 = vcmp.eq.f32.partialorder %v492_v39, 8.507059e+37  ;;  %v495_v44 = vor.u32 1.1754944e-38, %v494_v40 }
  0xe5   : > { %v531_v32 = vmul.f32 %v466_v38, %v1016_v15  ;;  %v486_v41 = vmul.f32 %v832_v14, %v485_v31  ;;  %v515_v17 = vsub.f32 1.0, %v514_v42  ;;  %v524_v45 = vand.u32 2147483648, %v1154_v2 }
  0xe6   : > { %537 = vst [vmem:[%s1134_s21 + $0x8] sm:$0xff] %v529_v35  ;;  %vm519_vm13 = vweird.f32 %v834_v37  ;;  %v522_v15 = vand.u32 2147483647, %v1154_v2  ;;  %vm518_vm14 = vweird.f32 %v1154_v2 }
  0xe7   : > { %539 = vst [vmem:[%s1134_s21 + $0x18] sm:$0xff] %v531_v32  ;;  %v487_v43 = vadd.f32 %v832_v14, %v486_v41  ;;  %v516_v47 = vmul.f32 %v834_v37, %v515_v17  ;;  %vm520_vm15 = vmor %vm518_vm14, %vm519_vm13  ;;  %v525_v51 = vor.u32 1.1754944e-38, %v524_v45 }
  0xe8   : > { %vm523_vm0 = vcmp.eq.f32.partialorder %v522_v15, 8.507059e+37 }
  0xe9   : > { %v491_v46 = vsel %vm490_vm11, %v832_v14, %v487_v43  ;;  %v517_v50 = vadd.f32 %v834_v37, %v516_v47  ;;  %v605_v57 = vld [vmem:[%s1134_s21 + $0x20] sm:$0xff] (%p960_p6) }
  0xea   : > { %v496_v48 = vsel %vm493_vm12, %v495_v44, %v491_v46  ;;  %v609_v18 = vld [vmem:[%s1134_s21 + $0x30] sm:$0xff] (%p960_p6)  ;;  %606 = vst [vmem:[%s554_s23 + $0x40] sm:$0xff] (%p960_p6), %v605_v57 }
  0xeb   : > { %v533_v49 = vmul.f32 %v496_v48, %v1002_v13  ;;  %v521_v52 = vsel %vm520_vm15, %v834_v37, %v517_v50  ;;  %550 = sbr.rel (!%p960_p6) target bundleno = 248 (0xf8), region = 74  ;;  %v597_v13 = vld [vmem:[%s1134_s21] sm:$0xff] (%p960_p6)  ;;  %610 = vst [vmem:[%s554_s23 + $0x60] sm:$0xff] (%p960_p6), %v609_v18 }
  0xec   : > { %v526_v53 = vsel %vm523_vm0, %v525_v51, %v521_v52  ;;  %598 = vst [vmem:[%s554_s23] sm:$0xff] (%p960_p6), %v597_v13 }
  0xed   : > { %541 = vst [vmem:[%s1134_s21 + $0x28] sm:$0xff] %v533_v49  ;;  %v535_v54 = vmul.f32 %v526_v53, %v992_v11  ;;  %v599_v55 = vld [vmem:[%s1134_s21 + $0x8] sm:$0xff] (%p960_p6)  ;;  %v601_v11 = vld [vmem:[%s1134_s21 + $0x10] sm:$0xff] (%p960_p6) }
  0xee   : > { %v603_v56 = vld [vmem:[%s1134_s21 + $0x18] sm:$0xff] (%p960_p6)  ;;  %600 = vst [vmem:[%s554_s23 + $0x10] sm:$0xff] (%p960_p6), %v599_v55 }
  0xef   : > { %543 = vst [vmem:[%s1134_s21 + $0x38] sm:$0xff] %v535_v54 }
  0xf0   : > { %602 = vst [vmem:[%s554_s23 + $0x20] sm:$0xff] %v601_v11 }
  0xf1   : > { %604 = vst [vmem:[%s554_s23 + $0x30] sm:$0xff] %v603_v56 }
  0xf4   : > { %v607_v58 = vld [vmem:[%s1134_s21 + $0x28] sm:$0xff] }
  0xf5   : > { %608 = vst [vmem:[%s554_s23 + $0x50] sm:$0xff] %v607_v58 }
  0xf6   : > { %v611_v59 = vld [vmem:[%s1134_s21 + $0x38] sm:$0xff] }
  0xf7   : > { %612 = vst [vmem:[%s554_s23 + $0x70] sm:$0xff] %v611_v59 }
  0xf8 PF: > { %s13_s18 = sadd.s32 1, %s889_s18   ;;  %s1241_s12 = smov %s869_s13 }
  0xf9   : > { %p10_p12 = scmp.ge.s32.totalorder %s13_s18, 6   ;;  %s1242_s13 = smov %s968_s27 }
  0xfa   : > { %s1243_s14 = smov %s881_s16  ;;  %s1244_s15 = smov %s885_s17 }
  0xfb   : > { %s1245_s16 = smov %s1248_s19  ;;  %s1246_s17 = smov %s1252_s20 }
  0xfc   :  { %12 = sbr.rel (!%p10_p12) target bundleno = 4 (0x4), region = 143 }

</bundles_post_ra>
